<compile_context>
chip_gen: v7x
topology: tpu7x:2x2x1
jax: 0.10.0
libtpu: 0.0.40
codegen_flags: <defaults>
</compile_context>

<pallas_src>
import functools

import jax
import jax.numpy as jnp
from jax.experimental import pallas as pl
from jax.experimental.pallas import tpu as pltpu  # noqa: F401  (kept for parity)


# ----------------------------- fused Pallas kernel -------------------------- #

def csdgcn_fused_kernel(ty_ref, tx_ref, adj_ref, sadj_ref,
                        wy_ref, by_ref, wx_ref, bx_ref,
                        fcw_ref, fcb_ref, o_ref):
    """Whole hot path in one program (no grid): 2x(3 GCN+relu) -> 2x pool -> fc."""
    ty = ty_ref[...]                                   # (B, S, D)  text_out
    tx = tx_ref[...]                                   # (B, M, D)  text_out1
    adj = adj_ref[...]                                 # (B, S, S)
    sadj = sadj_ref[...]                               # (B, M, M)

    # Row-normalisation depends only on the adjacency -> compute once per
    # branch (hoisted out of the 3-layer loop) and multiply instead of divide.
    inv_y = 1.0 / (jnp.sum(adj, axis=2, keepdims=True) + 1.0)    # (B, S, 1)
    inv_x = 1.0 / (jnp.sum(sadj, axis=2, keepdims=True) + 1.0)   # (B, M, 1)

    def gcn_stack(h, a, inv, w_ref, b_ref):
        """Three fused GraphConvolution+relu layers, weights resident in VMEM."""
        B, S, D = h.shape
        for l in range(3):                                        # static unroll
            # Pack (B*S, D) so the weight matmul is one MXU tile, not B slivers.
            hw = jnp.dot(h.reshape(B * S, D), w_ref[l],
                         preferred_element_type=jnp.float32).reshape(B, S, D)
            ah = jnp.einsum("bst,btd->bsd", a, hw,
                            preferred_element_type=jnp.float32)   # adj @ hidden
            h = jnp.maximum(ah * inv + b_ref[l], 0.0)             # /denom,+b,relu
        return h

    y = gcn_stack(ty, adj, inv_y, wy_ref, by_ref)                 # gc1, gc3, gc5
    x = gcn_stack(tx, sadj, inv_x, wx_ref, bx_ref)                # gc2, gc4, gc6

    def attn_pool(h, t):
        """softmax(sum_s(h @ t^T)) @ t   via   (sum_s h) . t  (no (S,S), no .T)."""
        hsum = jnp.sum(h, axis=1, keepdims=True)                  # (B, 1, D)
        s = jnp.einsum("bod,bkd->bok", hsum, t,
                       preferred_element_type=jnp.float32)        # (B, 1, K)
        s = s - jnp.max(s, axis=2, keepdims=True)
        e = jnp.exp(s)
        alpha = e / jnp.sum(e, axis=2, keepdims=True)             # softmax dim 2
        return jnp.einsum("bok,bkd->bod", alpha, t,
                          preferred_element_type=jnp.float32)     # (B, 1, D)

    y_pool = attn_pool(y, ty)                                     # (B, 1, D)
    x_pool = attn_pool(x, tx)                                     # (B, 1, D)

    temp = (x_pool + y_pool) * 0.5                                # mean of {x, y}

    # Final fc fused in as one packed (B, D) @ (D, P) matmul.
    B, _, D = ty.shape
    out = jnp.dot(temp.reshape(B, D), fcw_ref[...],
                  preferred_element_type=jnp.float32)             # (B, P)
    o_ref[...] = out + fcb_ref[...]                               # bias (1, P)


# ------------------------------ model wrapper ------------------------------ #

@functools.partial(jax.jit, static_argnames=("max_len",))
def csdgcn_forward(params, text_indices, adj, sentic_adj, max_len):
    # --- glue (plain JAX) ---
    text = params["embedding"][text_indices]             # nn.Embedding lookup
    # nn.Dropout(0.5): identity at inference.
    # TODO(synk): DynamicLSTM replaced by a linear projection (see header).
    text_out = jnp.dot(text, params["lstm_proj"])         # (B, S, 2H)
    B, S, D = text_out.shape
    # TODO(synk): BERT augmentation splicing skipped; zero-pad to max_len.
    pad = jnp.zeros((B, max_len - S, D), jnp.float32)
    text_out1 = jnp.concatenate([text_out, pad], axis=1)   # (B, max_len, 2H)

    # Stack per-branch weights/biases so the kernel holds them all in VMEM.
    wy = jnp.stack([params["gc1_w"], params["gc3_w"], params["gc5_w"]])  # (3,D,D)
    by = jnp.stack([params["gc1_b"], params["gc3_b"], params["gc5_b"]])  # (3,1,D)
    wx = jnp.stack([params["gc2_w"], params["gc4_w"], params["gc6_w"]])
    bx = jnp.stack([params["gc2_b"], params["gc4_b"], params["gc6_b"]])

    P = params["fc_w"].shape[1]
    # Single program, no grid: every operand is a whole-array VMEM block
    # (total < 64 KiB, far under VMEM on v5e/v6e/v7x).
    out = pl.pallas_call(
        csdgcn_fused_kernel,
        out_shape=jax.ShapeDtypeStruct((B, P), jnp.float32),
    )(text_out, text_out1, adj, sentic_adj, wy, by, wx, bx,
      params["fc_w"], params["fc_b"])
    return out                                            # (B, P)


# ---------------------------- pure-JAX reference ---------------------------- #

def _gcn_ref(text, adj, w, b):
    hidden = jnp.einsum("bsd,de->bse", text, w)
    denom = jnp.sum(adj, axis=2, keepdims=True) + 1.0
    return jax.nn.relu(jnp.einsum("bst,btd->bsd", adj, hidden) / denom + b)


def _pool_ref(h, t):
    am = jnp.einsum("bsd,btd->bst", h, t)
    alpha = jax.nn.softmax(jnp.sum(am, axis=1, keepdims=True), axis=2)
    return jnp.einsum("bot,btd->bod", alpha, t)[:, 0, :]


def csdgcn_ref(params, text_indices, adj, sentic_adj, max_len):
    text = params["embedding"][text_indices]
    text_out = jnp.dot(text, params["lstm_proj"])
    B, S, D = text_out.shape
    text_out1 = jnp.concatenate(
        [text_out, jnp.zeros((B, max_len - S, D), jnp.float32)], axis=1)
    x = _gcn_ref(text_out1, sentic_adj, params["gc2_w"], params["gc2_b"][0])
    x = _gcn_ref(x, sentic_adj, params["gc4_w"], params["gc4_b"][0])
    x = _gcn_ref(x, sentic_adj, params["gc6_w"], params["gc6_b"][0])
    y = _gcn_ref(text_out, adj, params["gc1_w"], params["gc1_b"][0])
    y = _gcn_ref(y, adj, params["gc3_w"], params["gc3_b"][0])
    y = _gcn_ref(y, adj, params["gc5_w"], params["gc5_b"][0])
    temp = (_pool_ref(x, text_out1) + _pool_ref(y, text_out)) * 0.5
    return jnp.dot(temp, params["fc_w"]) + params["fc_b"][0]


# ---------------------------------- main ----------------------------------- #

if __name__ == "__main__":
    # Small, module-consistent shapes.
    B, S, MAX_LEN = 2, 8, 16
    VOCAB, EMBED_DIM, HIDDEN_DIM, POLARITIES = 50, 24, 16, 3
    D = 2 * HIDDEN_DIM

    key = jax.random.PRNGKey(0)
    ks = jax.random.split(key, 16)

    params = {
        "embedding": jax.random.normal(ks[0], (VOCAB, EMBED_DIM), jnp.float32) * 0.1,
        "lstm_proj": jax.random.normal(ks[1], (EMBED_DIM, D), jnp.float32) * 0.1,
        "fc_w": jax.random.normal(ks[2], (D, POLARITIES), jnp.float32) * 0.1,
        "fc_b": jax.random.normal(ks[3], (1, POLARITIES), jnp.float32) * 0.1,
    }
    for n, idx in zip(("gc1", "gc2", "gc3", "gc4", "gc5", "gc6"), range(4, 10)):
        params[f"{n}_w"] = jax.random.normal(ks[idx], (D, D), jnp.float32) * 0.1
        params[f"{n}_b"] = jax.random.normal(ks[idx + 6], (1, D), jnp.float32) * 0.1

    text_indices = jax.random.randint(ks[10], (B, S), 1, VOCAB)
    adj = (jax.random.uniform(ks[11], (B, S, S)) > 0.5).astype(jnp.float32)
    sentic_adj = (jax.random.uniform(ks[12], (B, MAX_LEN, MAX_LEN)) > 0.5
                  ).astype(jnp.float32)

    out = csdgcn_forward(params, text_indices, adj, sentic_adj, MAX_LEN)
    out = jax.block_until_ready(out)

    ref = csdgcn_ref(params, text_indices, adj, sentic_adj, MAX_LEN)
    assert out.shape == (B, POLARITIES), out.shape
    assert jnp.allclose(out, ref, atol=1e-4, rtol=1e-4), (out, ref)

    print("KERNEL_OK")
</pallas_src>

<mosaic_0001>
module attributes {stable_mosaic.version = 11 : i64} {
  func.func @csdgcn_fused_kernel(%arg0: memref<2x8x32xf32, #tpu.memory_space<vmem>>, %arg1: memref<2x16x32xf32, #tpu.memory_space<vmem>>, %arg2: memref<2x8x8xf32, #tpu.memory_space<vmem>>, %arg3: memref<2x16x16xf32, #tpu.memory_space<vmem>>, %arg4: memref<3x32x32xf32, #tpu.memory_space<vmem>>, %arg5: memref<3x1x32xf32, #tpu.memory_space<vmem>>, %arg6: memref<3x32x32xf32, #tpu.memory_space<vmem>>, %arg7: memref<3x1x32xf32, #tpu.memory_space<vmem>>, %arg8: memref<32x3xf32, #tpu.memory_space<vmem>>, %arg9: memref<1x3xf32, #tpu.memory_space<vmem>>, %arg10: memref<2x3xf32, #tpu.memory_space<vmem>>) attributes {dimension_semantics = [], scalar_prefetch = 0 : i64, scratch_operands = 0 : i64, tpu.core_type = #tpu.core_type<tc>} {
    %c0 = arith.constant 0 : index
    %c0_0 = arith.constant 0 : index
    %c0_1 = arith.constant 0 : index
    %0 = vector.load %arg0[%c0, %c0_0, %c0_1] : memref<2x8x32xf32, #tpu.memory_space<vmem>>, vector<2x8x32xf32>
    %c0_2 = arith.constant 0 : index
    %c0_3 = arith.constant 0 : index
    %c0_4 = arith.constant 0 : index
    %1 = vector.load %arg1[%c0_2, %c0_3, %c0_4] : memref<2x16x32xf32, #tpu.memory_space<vmem>>, vector<2x16x32xf32>
    %c0_5 = arith.constant 0 : index
    %c0_6 = arith.constant 0 : index
    %c0_7 = arith.constant 0 : index
    %2 = vector.load %arg2[%c0_5, %c0_6, %c0_7] : memref<2x8x8xf32, #tpu.memory_space<vmem>>, vector<2x8x8xf32>
    %c0_8 = arith.constant 0 : index
    %c0_9 = arith.constant 0 : index
    %c0_10 = arith.constant 0 : index
    %3 = vector.load %arg3[%c0_8, %c0_9, %c0_10] : memref<2x16x16xf32, #tpu.memory_space<vmem>>, vector<2x16x16xf32>
    %cst = arith.constant dense<0.000000e+00> : vector<2x8xf32>
    %4 = vector.multi_reduction <add>, %2, %cst [2] : vector<2x8x8xf32> to vector<2x8xf32>
    %5 = vector.shape_cast %4 : vector<2x8xf32> to vector<2x8x1xf32>
    %cst_11 = arith.constant 1.000000e+00 : f32
    %6 = vector.broadcast %cst_11 : f32 to vector<2x8x1xf32>
    %7 = arith.addf %5, %6 : vector<2x8x1xf32>
    %cst_12 = arith.constant 1.000000e+00 : f32
    %8 = vector.broadcast %cst_12 : f32 to vector<2x8x1xf32>
    %9 = arith.divf %8, %7 : vector<2x8x1xf32>
    %cst_13 = arith.constant dense<0.000000e+00> : vector<2x16xf32>
    %10 = vector.multi_reduction <add>, %3, %cst_13 [2] : vector<2x16x16xf32> to vector<2x16xf32>
    %11 = vector.shape_cast %10 : vector<2x16xf32> to vector<2x16x1xf32>
    %cst_14 = arith.constant 1.000000e+00 : f32
    %12 = vector.broadcast %cst_14 : f32 to vector<2x16x1xf32>
    %13 = arith.addf %11, %12 : vector<2x16x1xf32>
    %cst_15 = arith.constant 1.000000e+00 : f32
    %14 = vector.broadcast %cst_15 : f32 to vector<2x16x1xf32>
    %15 = arith.divf %14, %13 : vector<2x16x1xf32>
    %16 = vector.shape_cast %0 : vector<2x8x32xf32> to vector<16x32xf32>
    %c0_16 = arith.constant 0 : index
    %c0_17 = arith.constant 0 : index
    %c0_18 = arith.constant 0 : index
    %17 = vector.load %arg4[%c0_16, %c0_17, %c0_18] : memref<3x32x32xf32, #tpu.memory_space<vmem>>, vector<1x32x32xf32>
    %18 = vector.shape_cast %17 : vector<1x32x32xf32> to vector<32x32xf32>
    %cst_19 = arith.constant dense<0.000000e+00> : vector<16x32xf32>
    %19 = tpu.matmul %16, %18, %cst_19 {dimension_numbers = #tpu.dot_dimension_numbers<[1], [0], [0], [1], [0, 0, 1, 1], [], []>} : vector<16x32xf32>, vector<32x32xf32>, vector<16x32xf32> -> vector<16x32xf32>
    %20 = vector.shape_cast %19 : vector<16x32xf32> to vector<2x8x32xf32>
    "tpu.trace_start"() <{level = 10 : i32, message = "bst,btd->bsd"}> : () -> ()
    %cst_20 = arith.constant dense<0.000000e+00> : vector<2x8x32xf32>
    %21 = tpu.matmul %2, %20, %cst_20 {dimension_numbers = #tpu.dot_dimension_numbers<[2], [1], [1], [2], [0, 0, 0, 1, 1, 2], [0], [0]>} : vector<2x8x8xf32>, vector<2x8x32xf32>, vector<2x8x32xf32> -> vector<2x8x32xf32>
    "tpu.trace_stop"() : () -> ()
    %22 = vector.broadcast %9 : vector<2x8x1xf32> to vector<2x8x32xf32>
    %23 = arith.mulf %21, %22 : vector<2x8x32xf32>
    %c0_21 = arith.constant 0 : index
    %c0_22 = arith.constant 0 : index
    %c0_23 = arith.constant 0 : index
    %24 = vector.load %arg5[%c0_21, %c0_22, %c0_23] : memref<3x1x32xf32, #tpu.memory_space<vmem>>, vector<1x1x32xf32>
    %25 = vector.shape_cast %24 : vector<1x1x32xf32> to vector<1x32xf32>
    %26 = vector.shape_cast %25 : vector<1x32xf32> to vector<1x1x32xf32>
    %27 = vector.broadcast %26 : vector<1x1x32xf32> to vector<2x8x32xf32>
    %28 = arith.addf %23, %27 : vector<2x8x32xf32>
    %cst_24 = arith.constant 0.000000e+00 : f32
    %29 = vector.broadcast %cst_24 : f32 to vector<2x8x32xf32>
    %30 = arith.maximumf %28, %29 : vector<2x8x32xf32>
    %31 = vector.shape_cast %30 : vector<2x8x32xf32> to vector<16x32xf32>
    %c1 = arith.constant 1 : index
    %c0_25 = arith.constant 0 : index
    %c0_26 = arith.constant 0 : index
    %32 = vector.load %arg4[%c1, %c0_25, %c0_26] : memref<3x32x32xf32, #tpu.memory_space<vmem>>, vector<1x32x32xf32>
    %33 = vector.shape_cast %32 : vector<1x32x32xf32> to vector<32x32xf32>
    %cst_27 = arith.constant dense<0.000000e+00> : vector<16x32xf32>
    %34 = tpu.matmul %31, %33, %cst_27 {dimension_numbers = #tpu.dot_dimension_numbers<[1], [0], [0], [1], [0, 0, 1, 1], [], []>} : vector<16x32xf32>, vector<32x32xf32>, vector<16x32xf32> -> vector<16x32xf32>
    %35 = vector.shape_cast %34 : vector<16x32xf32> to vector<2x8x32xf32>
    "tpu.trace_start"() <{level = 10 : i32, message = "bst,btd->bsd"}> : () -> ()
    %cst_28 = arith.constant dense<0.000000e+00> : vector<2x8x32xf32>
    %36 = tpu.matmul %2, %35, %cst_28 {dimension_numbers = #tpu.dot_dimension_numbers<[2], [1], [1], [2], [0, 0, 0, 1, 1, 2], [0], [0]>} : vector<2x8x8xf32>, vector<2x8x32xf32>, vector<2x8x32xf32> -> vector<2x8x32xf32>
    "tpu.trace_stop"() : () -> ()
    %37 = vector.broadcast %9 : vector<2x8x1xf32> to vector<2x8x32xf32>
    %38 = arith.mulf %36, %37 : vector<2x8x32xf32>
    %c1_29 = arith.constant 1 : index
    %c0_30 = arith.constant 0 : index
    %c0_31 = arith.constant 0 : index
    %39 = vector.load %arg5[%c1_29, %c0_30, %c0_31] : memref<3x1x32xf32, #tpu.memory_space<vmem>>, vector<1x1x32xf32>
    %40 = vector.shape_cast %39 : vector<1x1x32xf32> to vector<1x32xf32>
    %41 = vector.shape_cast %40 : vector<1x32xf32> to vector<1x1x32xf32>
    %42 = vector.broadcast %41 : vector<1x1x32xf32> to vector<2x8x32xf32>
    %43 = arith.addf %38, %42 : vector<2x8x32xf32>
    %cst_32 = arith.constant 0.000000e+00 : f32
    %44 = vector.broadcast %cst_32 : f32 to vector<2x8x32xf32>
    %45 = arith.maximumf %43, %44 : vector<2x8x32xf32>
    %46 = vector.shape_cast %45 : vector<2x8x32xf32> to vector<16x32xf32>
    %c2 = arith.constant 2 : index
    %c0_33 = arith.constant 0 : index
    %c0_34 = arith.constant 0 : index
    %47 = vector.load %arg4[%c2, %c0_33, %c0_34] : memref<3x32x32xf32, #tpu.memory_space<vmem>>, vector<1x32x32xf32>
    %48 = vector.shape_cast %47 : vector<1x32x32xf32> to vector<32x32xf32>
    %cst_35 = arith.constant dense<0.000000e+00> : vector<16x32xf32>
    %49 = tpu.matmul %46, %48, %cst_35 {dimension_numbers = #tpu.dot_dimension_numbers<[1], [0], [0], [1], [0, 0, 1, 1], [], []>} : vector<16x32xf32>, vector<32x32xf32>, vector<16x32xf32> -> vector<16x32xf32>
    %50 = vector.shape_cast %49 : vector<16x32xf32> to vector<2x8x32xf32>
    "tpu.trace_start"() <{level = 10 : i32, message = "bst,btd->bsd"}> : () -> ()
    %cst_36 = arith.constant dense<0.000000e+00> : vector<2x8x32xf32>
    %51 = tpu.matmul %2, %50, %cst_36 {dimension_numbers = #tpu.dot_dimension_numbers<[2], [1], [1], [2], [0, 0, 0, 1, 1, 2], [0], [0]>} : vector<2x8x8xf32>, vector<2x8x32xf32>, vector<2x8x32xf32> -> vector<2x8x32xf32>
    "tpu.trace_stop"() : () -> ()
    %52 = vector.broadcast %9 : vector<2x8x1xf32> to vector<2x8x32xf32>
    %53 = arith.mulf %51, %52 : vector<2x8x32xf32>
    %c2_37 = arith.constant 2 : index
    %c0_38 = arith.constant 0 : index
    %c0_39 = arith.constant 0 : index
    %54 = vector.load %arg5[%c2_37, %c0_38, %c0_39] : memref<3x1x32xf32, #tpu.memory_space<vmem>>, vector<1x1x32xf32>
    %55 = vector.shape_cast %54 : vector<1x1x32xf32> to vector<1x32xf32>
    %56 = vector.shape_cast %55 : vector<1x32xf32> to vector<1x1x32xf32>
    %57 = vector.broadcast %56 : vector<1x1x32xf32> to vector<2x8x32xf32>
    %58 = arith.addf %53, %57 : vector<2x8x32xf32>
    %cst_40 = arith.constant 0.000000e+00 : f32
    %59 = vector.broadcast %cst_40 : f32 to vector<2x8x32xf32>
    %60 = arith.maximumf %58, %59 : vector<2x8x32xf32>
    %61 = vector.shape_cast %1 : vector<2x16x32xf32> to vector<32x32xf32>
    %c0_41 = arith.constant 0 : index
    %c0_42 = arith.constant 0 : index
    %c0_43 = arith.constant 0 : index
    %62 = vector.load %arg6[%c0_41, %c0_42, %c0_43] : memref<3x32x32xf32, #tpu.memory_space<vmem>>, vector<1x32x32xf32>
    %63 = vector.shape_cast %62 : vector<1x32x32xf32> to vector<32x32xf32>
    %cst_44 = arith.constant dense<0.000000e+00> : vector<32x32xf32>
    %64 = tpu.matmul %61, %63, %cst_44 {dimension_numbers = #tpu.dot_dimension_numbers<[1], [0], [0], [1], [0, 0, 1, 1], [], []>} : vector<32x32xf32>, vector<32x32xf32>, vector<32x32xf32> -> vector<32x32xf32>
    %65 = vector.shape_cast %64 : vector<32x32xf32> to vector<2x16x32xf32>
    "tpu.trace_start"() <{level = 10 : i32, message = "bst,btd->bsd"}> : () -> ()
    %cst_45 = arith.constant dense<0.000000e+00> : vector<2x16x32xf32>
    %66 = tpu.matmul %3, %65, %cst_45 {dimension_numbers = #tpu.dot_dimension_numbers<[2], [1], [1], [2], [0, 0, 0, 1, 1, 2], [0], [0]>} : vector<2x16x16xf32>, vector<2x16x32xf32>, vector<2x16x32xf32> -> vector<2x16x32xf32>
    "tpu.trace_stop"() : () -> ()
    %67 = vector.broadcast %15 : vector<2x16x1xf32> to vector<2x16x32xf32>
    %68 = arith.mulf %66, %67 : vector<2x16x32xf32>
    %c0_46 = arith.constant 0 : index
    %c0_47 = arith.constant 0 : index
    %c0_48 = arith.constant 0 : index
    %69 = vector.load %arg7[%c0_46, %c0_47, %c0_48] : memref<3x1x32xf32, #tpu.memory_space<vmem>>, vector<1x1x32xf32>
    %70 = vector.shape_cast %69 : vector<1x1x32xf32> to vector<1x32xf32>
    %71 = vector.shape_cast %70 : vector<1x32xf32> to vector<1x1x32xf32>
    %72 = vector.broadcast %71 : vector<1x1x32xf32> to vector<2x16x32xf32>
    %73 = arith.addf %68, %72 : vector<2x16x32xf32>
    %cst_49 = arith.constant 0.000000e+00 : f32
    %74 = vector.broadcast %cst_49 : f32 to vector<2x16x32xf32>
    %75 = arith.maximumf %73, %74 : vector<2x16x32xf32>
    %76 = vector.shape_cast %75 : vector<2x16x32xf32> to vector<32x32xf32>
    %c1_50 = arith.constant 1 : index
    %c0_51 = arith.constant 0 : index
    %c0_52 = arith.constant 0 : index
    %77 = vector.load %arg6[%c1_50, %c0_51, %c0_52] : memref<3x32x32xf32, #tpu.memory_space<vmem>>, vector<1x32x32xf32>
    %78 = vector.shape_cast %77 : vector<1x32x32xf32> to vector<32x32xf32>
    %cst_53 = arith.constant dense<0.000000e+00> : vector<32x32xf32>
    %79 = tpu.matmul %76, %78, %cst_53 {dimension_numbers = #tpu.dot_dimension_numbers<[1], [0], [0], [1], [0, 0, 1, 1], [], []>} : vector<32x32xf32>, vector<32x32xf32>, vector<32x32xf32> -> vector<32x32xf32>
    %80 = vector.shape_cast %79 : vector<32x32xf32> to vector<2x16x32xf32>
    "tpu.trace_start"() <{level = 10 : i32, message = "bst,btd->bsd"}> : () -> ()
    %cst_54 = arith.constant dense<0.000000e+00> : vector<2x16x32xf32>
    %81 = tpu.matmul %3, %80, %cst_54 {dimension_numbers = #tpu.dot_dimension_numbers<[2], [1], [1], [2], [0, 0, 0, 1, 1, 2], [0], [0]>} : vector<2x16x16xf32>, vector<2x16x32xf32>, vector<2x16x32xf32> -> vector<2x16x32xf32>
    "tpu.trace_stop"() : () -> ()
    %82 = vector.broadcast %15 : vector<2x16x1xf32> to vector<2x16x32xf32>
    %83 = arith.mulf %81, %82 : vector<2x16x32xf32>
    %c1_55 = arith.constant 1 : index
    %c0_56 = arith.constant 0 : index
    %c0_57 = arith.constant 0 : index
    %84 = vector.load %arg7[%c1_55, %c0_56, %c0_57] : memref<3x1x32xf32, #tpu.memory_space<vmem>>, vector<1x1x32xf32>
    %85 = vector.shape_cast %84 : vector<1x1x32xf32> to vector<1x32xf32>
    %86 = vector.shape_cast %85 : vector<1x32xf32> to vector<1x1x32xf32>
    %87 = vector.broadcast %86 : vector<1x1x32xf32> to vector<2x16x32xf32>
    %88 = arith.addf %83, %87 : vector<2x16x32xf32>
    %cst_58 = arith.constant 0.000000e+00 : f32
    %89 = vector.broadcast %cst_58 : f32 to vector<2x16x32xf32>
    %90 = arith.maximumf %88, %89 : vector<2x16x32xf32>
    %91 = vector.shape_cast %90 : vector<2x16x32xf32> to vector<32x32xf32>
    %c2_59 = arith.constant 2 : index
    %c0_60 = arith.constant 0 : index
    %c0_61 = arith.constant 0 : index
    %92 = vector.load %arg6[%c2_59, %c0_60, %c0_61] : memref<3x32x32xf32, #tpu.memory_space<vmem>>, vector<1x32x32xf32>
    %93 = vector.shape_cast %92 : vector<1x32x32xf32> to vector<32x32xf32>
    %cst_62 = arith.constant dense<0.000000e+00> : vector<32x32xf32>
    %94 = tpu.matmul %91, %93, %cst_62 {dimension_numbers = #tpu.dot_dimension_numbers<[1], [0], [0], [1], [0, 0, 1, 1], [], []>} : vector<32x32xf32>, vector<32x32xf32>, vector<32x32xf32> -> vector<32x32xf32>
    %95 = vector.shape_cast %94 : vector<32x32xf32> to vector<2x16x32xf32>
    "tpu.trace_start"() <{level = 10 : i32, message = "bst,btd->bsd"}> : () -> ()
    %cst_63 = arith.constant dense<0.000000e+00> : vector<2x16x32xf32>
    %96 = tpu.matmul %3, %95, %cst_63 {dimension_numbers = #tpu.dot_dimension_numbers<[2], [1], [1], [2], [0, 0, 0, 1, 1, 2], [0], [0]>} : vector<2x16x16xf32>, vector<2x16x32xf32>, vector<2x16x32xf32> -> vector<2x16x32xf32>
    "tpu.trace_stop"() : () -> ()
    %97 = vector.broadcast %15 : vector<2x16x1xf32> to vector<2x16x32xf32>
    %98 = arith.mulf %96, %97 : vector<2x16x32xf32>
    %c2_64 = arith.constant 2 : index
    %c0_65 = arith.constant 0 : index
    %c0_66 = arith.constant 0 : index
    %99 = vector.load %arg7[%c2_64, %c0_65, %c0_66] : memref<3x1x32xf32, #tpu.memory_space<vmem>>, vector<1x1x32xf32>
    %100 = vector.shape_cast %99 : vector<1x1x32xf32> to vector<1x32xf32>
    %101 = vector.shape_cast %100 : vector<1x32xf32> to vector<1x1x32xf32>
    %102 = vector.broadcast %101 : vector<1x1x32xf32> to vector<2x16x32xf32>
    %103 = arith.addf %98, %102 : vector<2x16x32xf32>
    %cst_67 = arith.constant 0.000000e+00 : f32
    %104 = vector.broadcast %cst_67 : f32 to vector<2x16x32xf32>
    %105 = arith.maximumf %103, %104 : vector<2x16x32xf32>
    %cst_68 = arith.constant dense<0.000000e+00> : vector<2x32xf32>
    %106 = vector.multi_reduction <add>, %60, %cst_68 [1] : vector<2x8x32xf32> to vector<2x32xf32>
    %107 = vector.shape_cast %106 : vector<2x32xf32> to vector<2x1x32xf32>
    "tpu.trace_start"() <{level = 10 : i32, message = "bod,bkd->bok"}> : () -> ()
    %cst_69 = arith.constant dense<0.000000e+00> : vector<2x1x8xf32>
    %108 = tpu.matmul %107, %0, %cst_69 {dimension_numbers = #tpu.dot_dimension_numbers<[2], [2], [1], [1], [0, 0, 0, 1, 1, 1], [0], [0]>} : vector<2x1x32xf32>, vector<2x8x32xf32>, vector<2x1x8xf32> -> vector<2x1x8xf32>
    "tpu.trace_stop"() : () -> ()
    %cst_70 = arith.constant dense<0xFF800000> : vector<2x1xf32>
    %109 = vector.multi_reduction <maximumf>, %108, %cst_70 [2] : vector<2x1x8xf32> to vector<2x1xf32>
    %110 = vector.shape_cast %109 : vector<2x1xf32> to vector<2x1x1xf32>
    %111 = vector.broadcast %110 : vector<2x1x1xf32> to vector<2x1x8xf32>
    %112 = arith.subf %108, %111 : vector<2x1x8xf32>
    %113 = math.exp %112 : vector<2x1x8xf32>
    %cst_71 = arith.constant dense<0.000000e+00> : vector<2x1xf32>
    %114 = vector.multi_reduction <add>, %113, %cst_71 [2] : vector<2x1x8xf32> to vector<2x1xf32>
    %115 = vector.shape_cast %114 : vector<2x1xf32> to vector<2x1x1xf32>
    %116 = vector.broadcast %115 : vector<2x1x1xf32> to vector<2x1x8xf32>
    %117 = arith.divf %113, %116 : vector<2x1x8xf32>
    "tpu.trace_start"() <{level = 10 : i32, message = "bok,bkd->bod"}> : () -> ()
    %cst_72 = arith.constant dense<0.000000e+00> : vector<2x1x32xf32>
    %118 = tpu.matmul %117, %0, %cst_72 {dimension_numbers = #tpu.dot_dimension_numbers<[2], [1], [1], [2], [0, 0, 0, 1, 1, 2], [0], [0]>} : vector<2x1x8xf32>, vector<2x8x32xf32>, vector<2x1x32xf32> -> vector<2x1x32xf32>
    "tpu.trace_stop"() : () -> ()
    %cst_73 = arith.constant dense<0.000000e+00> : vector<2x32xf32>
    %119 = vector.multi_reduction <add>, %105, %cst_73 [1] : vector<2x16x32xf32> to vector<2x32xf32>
    %120 = vector.shape_cast %119 : vector<2x32xf32> to vector<2x1x32xf32>
    "tpu.trace_start"() <{level = 10 : i32, message = "bod,bkd->bok"}> : () -> ()
    %cst_74 = arith.constant dense<0.000000e+00> : vector<2x1x16xf32>
    %121 = tpu.matmul %120, %1, %cst_74 {dimension_numbers = #tpu.dot_dimension_numbers<[2], [2], [1], [1], [0, 0, 0, 1, 1, 1], [0], [0]>} : vector<2x1x32xf32>, vector<2x16x32xf32>, vector<2x1x16xf32> -> vector<2x1x16xf32>
    "tpu.trace_stop"() : () -> ()
    %cst_75 = arith.constant dense<0xFF800000> : vector<2x1xf32>
    %122 = vector.multi_reduction <maximumf>, %121, %cst_75 [2] : vector<2x1x16xf32> to vector<2x1xf32>
    %123 = vector.shape_cast %122 : vector<2x1xf32> to vector<2x1x1xf32>
    %124 = vector.broadcast %123 : vector<2x1x1xf32> to vector<2x1x16xf32>
    %125 = arith.subf %121, %124 : vector<2x1x16xf32>
    %126 = math.exp %125 : vector<2x1x16xf32>
    %cst_76 = arith.constant dense<0.000000e+00> : vector<2x1xf32>
    %127 = vector.multi_reduction <add>, %126, %cst_76 [2] : vector<2x1x16xf32> to vector<2x1xf32>
    %128 = vector.shape_cast %127 : vector<2x1xf32> to vector<2x1x1xf32>
    %129 = vector.broadcast %128 : vector<2x1x1xf32> to vector<2x1x16xf32>
    %130 = arith.divf %126, %129 : vector<2x1x16xf32>
    "tpu.trace_start"() <{level = 10 : i32, message = "bok,bkd->bod"}> : () -> ()
    %cst_77 = arith.constant dense<0.000000e+00> : vector<2x1x32xf32>
    %131 = tpu.matmul %130, %1, %cst_77 {dimension_numbers = #tpu.dot_dimension_numbers<[2], [1], [1], [2], [0, 0, 0, 1, 1, 2], [0], [0]>} : vector<2x1x16xf32>, vector<2x16x32xf32>, vector<2x1x32xf32> -> vector<2x1x32xf32>
    "tpu.trace_stop"() : () -> ()
    %132 = arith.addf %131, %118 : vector<2x1x32xf32>
    %cst_78 = arith.constant 5.000000e-01 : f32
    %133 = vector.broadcast %cst_78 : f32 to vector<2x1x32xf32>
    %134 = arith.mulf %132, %133 : vector<2x1x32xf32>
    %135 = vector.shape_cast %134 : vector<2x1x32xf32> to vector<2x32xf32>
    %c0_79 = arith.constant 0 : index
    %c0_80 = arith.constant 0 : index
    %136 = vector.load %arg8[%c0_79, %c0_80] : memref<32x3xf32, #tpu.memory_space<vmem>>, vector<32x3xf32>
    %cst_81 = arith.constant dense<0.000000e+00> : vector<2x3xf32>
    %137 = tpu.matmul %135, %136, %cst_81 {dimension_numbers = #tpu.dot_dimension_numbers<[1], [0], [0], [1], [0, 0, 1, 1], [], []>} : vector<2x32xf32>, vector<32x3xf32>, vector<2x3xf32> -> vector<2x3xf32>
    %c0_82 = arith.constant 0 : index
    %c0_83 = arith.constant 0 : index
    %138 = vector.load %arg9[%c0_82, %c0_83] : memref<1x3xf32, #tpu.memory_space<vmem>>, vector<1x3xf32>
    %139 = vector.broadcast %138 : vector<1x3xf32> to vector<2x3xf32>
    %140 = arith.addf %137, %139 : vector<2x3xf32>
    %c0_84 = arith.constant 0 : index
    %c0_85 = arith.constant 0 : index
    %141 = vector.load %arg10[%c0_84, %c0_85] : memref<2x3xf32, #tpu.memory_space<vmem>>, vector<2x3xf32>
    tpu.vector_store %arg10[%c0_84, %c0_85], %140 {strides = array<i32>} : memref<2x3xf32, #tpu.memory_space<vmem>>, vector<2x3xf32>,
    return
  }
}

</mosaic_0001>

<bundles_post_ra>
// kernel: csdgcn_forward.1
= control target key start
LH: loop header
LB: loop body
LE: loop exit
PB: predicated region body
PF: predicated region fallthrough
CT: control target
= control target key end

     0   :  { %vm90_vm0 = vcmask 261120   ;;  %s3378_s0 = inlined_call_operand.vmem [shape: f32[2,8,32], index: 0, kind: input, shape index: {}]   ;;  %s3379_s1 = inlined_call_operand.vmem [shape: f32[2,16,32], index: 1, kind: input, shape index: {}]   ;;  %s3380_s2 = inlined_call_operand.vmem [shape: f32[2,8,8], index: 2, kind: input, shape index: {}]   ;;  %s3381_s3 = inlined_call_operand.vmem [shape: f32[2,16,16], index: 3, kind: input, shape index: {}]   ;;  %s3382_s4 = inlined_call_operand.vmem [shape: f32[3,32,32], index: 4, kind: input, shape index: {}]   ;;  %s3383_s5 = inlined_call_operand.vmem [shape: f32[3,1,32], index: 5, kind: input, shape index: {}]   ;;  %s3384_s6 = inlined_call_operand.vmem [shape: f32[3,32,32], index: 6, kind: input, shape index: {}]   ;;  %s3385_s7 = inlined_call_operand.vmem [shape: f32[3,1,32], index: 7, kind: input, shape index: {}]   ;;  %s3386_s8 = inlined_call_operand.vmem [shape: f32[32,3], index: 8, kind: input, shape index: {}]   ;;  %s3387_s9 = inlined_call_operand.vmem [shape: f32[1,3], index: 9, kind: input, shape index: {}]   ;;  %s3388_s10 = inlined_call_operand.hbm [shape: f32[2,3], index: 10, kind: output, shape index: {}]  }
   0x1   :  { %v86_v0 = vld [vmem:[%s3382_s4] sm:$0xff]  ;;  %v87_v1 = vld [vmem:[%s3382_s4 + $0x8] sm:$0xff]  ;;  %v88_v2 = vld [vmem:[%s3382_s4 + $0x10] sm:$0xff] }
   0x2   :  { %v2792_v3 = vpack.c.bf16 %v87_v1, %v86_v0  ;;  %v89_v4 = vld [vmem:[%s3382_s4 + $0x18] sm:$0xff]  ;;  %v3018_v5 = vld [vmem:[%s3378_s0] sm:$0xff] }
   0x3   :  { %v2796_v6 = vpack.c.bf16 %v89_v4, %v88_v2  ;;  %2594 = vmatprep.mubr.msk.f32.mxu0 %vm90_vm0, %v3018_v5 }
   0x4   :  { %15 = vsyncpa [#allocation3], 0  ;;  %2793 = vmatprep.subr.bf16.mxu0 %v2792_v3  ;;  %v3025_v7 = vld [vmem:[%s3378_s0 + $0x8] sm:$0xff]  ;;  %v2944_v8 = vmov 0.0   ;;  %vm2945_vm1 = vmmov 0   ;;  %v3038_v9 = vld [vmem:[%s3380_s2] sm:$0xff] }
   0x5   :  { %2795 = vmatpush3.bf16.msra.mxu0 %v2792_v3  ;;  %2597 = vmatprep.subr.mxu1 %v2944_v8  ;;  %vm48_vm2 = vcmask 64512   ;;  %v3045_v11 = vld [vmem:[%s3380_s2 + $0x8] sm:$0xff]  ;;  %v2410_v15 = vld [vmem:[%s3382_s4 + $0x20] sm:$0xff]  ;;  %v2412_v18 = vld [vmem:[%s3382_s4 + $0x30] sm:$0xff]  ;;  %vm61_vm3 = vcmask 130048   ;;  %vm1797_vm4 = vcmask 57344  }
   0x6   :  { %2797 = vmatprep.subr.bf16.mxu0 %v2796_v6  ;;  %2599 = vmatprep.mubr.msk.f32.mxu1 %vm2945_vm1, %v2944_v8  ;;  %v49_v10 = vsel %vm48_vm2, %v3038_v9, 0.0  ;;  %v52_v12 = vsel %vm48_vm2, %v3045_v11, 0.0  ;;  %v2411_v16 = vld [vmem:[%s3382_s4 + $0x28] sm:$0xff]  ;;  %v2413_v19 = vld [vmem:[%s3382_s4 + $0x38] sm:$0xff]  ;;  %v2409_v27 = vld [vmem:[%s3383_s5] ss:$0 sm:$0xff] }
   0x7   :  { %50 = vadd.xlane.f32.xlu0 %v49_v10  ;;  %v2800_v17 = vpack.c.bf16 %v2411_v16, %v2410_v15  ;;  %v2804_v20 = vpack.c.bf16 %v2413_v19, %v2412_v18  ;;  %v2420_v40 = vld [vmem:[%s3382_s4 + $0x40] sm:$0xff]  ;;  %v2421_v41 = vld [vmem:[%s3382_s4 + $0x48] sm:$0xff]  ;;  %v2422_v43 = vld [vmem:[%s3382_s4 + $0x50] sm:$0xff]  ;;  %vm2130_vm6 = vcmask 122880   ;;  %vm2315_vm7 = vcmask 1041409   ;;  %s2947_s29 = smov [#allocation2]  }
   0x8   :  { %v2808_v42 = vpack.c.bf16 %v2421_v41, %v2420_v40  ;;  %v2423_v44 = vld [vmem:[%s3382_s4 + $0x58] sm:$0xff]  ;;  %v811_v46 = vld [vmem:[%s3384_s6] sm:$0xff]  ;;  %v812_v47 = vld [vmem:[%s3384_s6 + $0x8] sm:$0xff]  ;;  %s2397_s30 = sshll.u32 %s2947_s29, 4  ;;  %vm2389_vm8 = vcmask 17408   ;;  %s2398_s30 = int_to_ptr.vmem [resolvable:$true] %s2397_s30 }
   0x9   :  { %2799 = vmatpush3.bf16.msra.mxu0 %v2796_v6  ;;  %v2812_v45 = vpack.c.bf16 %v2423_v44, %v2422_v43  ;;  %v2816_v48 = vpack.c.bf16 %v812_v47, %v811_v46  ;;  %v2419_v50 = vld [vmem:[%s3383_s5 + $0x1] ss:$0 sm:$0xff]  ;;  %v813_v58 = vld [vmem:[%s3384_s6 + $0x10] sm:$0xff]  ;;  %v814_v59 = vld [vmem:[%s3384_s6 + $0x18] sm:$0xff]  ;;  %p2925_p1 = scmp.lt.s32.totalorder %s2398_s30, %s2398_s30 }
   0xa   :  { %2623 = vmatprep.subr.mxu0 %v2944_v8  ;;  %v2820_v62 = vpack.c.bf16 %v814_v59, %v813_v58  ;;  %v3121_v63 = vld [vmem:[%s3379_s1] sm:$0xff]  ;;  %v3130_v0 = vld [vmem:[%s3379_s1 + $0x8] sm:$0xff]  ;;  %v3135_v1 = vld [vmem:[%s3379_s1 + $0x10] sm:$0xff] }
   0xb   :  { %53 = vadd.xlane.f32.xlu0 %v52_v12  ;;  %v3144_v2 = vld [vmem:[%s3379_s1 + $0x18] sm:$0xff]  ;;  %v3151_v3 = vld [vmem:[%s3381_s3] sm:$0xff]  ;;  %v3156_v4 = vld [vmem:[%s3381_s3 + $0x10] sm:$0xff] }
   0xc   :  { %2595 = vmatmul.mubr.msk.f32.vlgmr.msra.gmra.mrb[0].mxu0 %vm90_vm0, %v3025_v7  ;;  %v62_v6 = vsel %vm61_vm3, %v3151_v3, 0.0  ;;  %v68_v10 = vsel %vm61_vm3, %v3156_v4, 0.0  ;;  %v3165_v12 = vld [vmem:[%s3381_s3 + $0x8] sm:$0xff]  ;;  %v2438_v47 = vld [vmem:[%s3385_s7] ss:$0 sm:$0xff]  ;;  %vm3315_vm5 = vmpackc.low %vm90_vm0, %vm90_vm0 }
   0xd   :  { %2625 = vmatprep.mubr.msk.f32.mxu0 %vm2945_vm1, %v2944_v8  ;;  %63 = vadd.xlane.f32.xlu1 %v62_v6 }
   0xf   :  { %69 = vadd.xlane.f32.xlu0 %v68_v10 }
  0x94   :  { %v51_v21 = vpop.xlane.xlu0 %50 }
  0x95   :  { %v55_v22 = vadd.f32 1.0, %v51_v21 }
  0x97   :  { %2892 = vrcp.f32 %v55_v22 }
  0x98   :  { %v54_v23 = vpop.xlane.xlu0 %53 }
  0x99   :  { %v56_v24 = vadd.f32 1.0, %v54_v23  ;;  %v2440_v23 = vld [vmem:[%s3384_s6 + $0x28] sm:$0xff] }
  0x9b   :  { %2894 = vrcp.f32 %v56_v24 }
  0xa1   :  { %v3069_v25 = vpop.eup %2892 }
  0xa5   :  { %v3075_v30 = vpop.eup %2894 }
  0xdf   :  { %v2596_v13 = vpop.f32.mrb[0].mxu0 }
  0xe0   :  { %v163_v14 = vpop.f32.mrb[1].mxu0 }
  0xe1   :  { %2598 = vmatpush3.msra.mxu1 %v163_v14  ;;  %v3172_v14 = vld [vmem:[%s3381_s3 + $0x18] sm:$0xff] }
  0xe2   :  { %2600 = vmatmul.mubr.msk.f32.vlgmr.msra.gmra.mrb[0].mxu1 %vm48_vm2, %v3038_v9  ;;  %2602 = vmatprep.subr.mxu1 %v2944_v8  ;;  %v71_v15 = vsel %vm61_vm3, %v3172_v14, 0.0 }
  0xe3   :  { %2603 = vmatpush3.msra.mxu1 %v2596_v13  ;;  %2604 = vmatprep.mubr.msk.f32.mxu1 %vm2945_vm1, %v2944_v8  ;;  %v65_v13 = vsel %vm61_vm3, %v3165_v12, 0.0 }
  0xe4   :  { %2801 = vmatprep.subr.bf16.mxu1 %v2800_v17  ;;  %66 = vadd.xlane.f32.xlu1 %v65_v13 }
  0xe6   :  { %2605 = vmatmul.mubr.msk.f32.vlgmr.msra.gmra.mrb[2].mxu1 %vm48_vm2, %v3045_v11 }
  0xe7   :  { %2803 = vmatpush3.bf16.msra.mxu1 %v2800_v17 }
  0xe8   :  { %2805 = vmatprep.subr.bf16.mxu1 %v2804_v20  ;;  %72 = vadd.xlane.f32.xlu1 %v71_v15 }
  0xeb   :  { %2807 = vmatpush3.bf16.msra.mxu1 %v2804_v20 }
  0xec   :  { %2618 = vmatprep.subr.mxu1 %v2944_v8 }
 0x1b5   :  { %v241_v26 = vpop.f32.mrb[0].mxu1 }
 0x1b6   :  { %v318_v28 = vmul.f32 %v3069_v25, %v241_v26  ;;  %v2601_v29 = vpop.f32.mrb[1].mxu1  ;;  %v2441_v26 = vld [vmem:[%s3384_s6 + $0x30] sm:$0xff] }
 0x1b7   :  { %v64_v29 = vpop.xlane.xlu1 %63 }
 0x1b8   :  { %v327_v31 = vadd.f32 %v2409_v27, %v318_v28 }
 0x1b9   :  { %v314_v32 = vpop.f32.mrb[2].mxu1 }
 0x1ba   :  { %v329_v33 = vmax.f32 %v327_v31, 0.0  ;;  %v319_v34 = vmul.f32 %v3075_v30, %v314_v32  ;;  %v2606_v35 = vpop.f32.mrb[3].mxu1 }
 0x1bb   :  { %v67_v31 = vpop.xlane.xlu1 %66  ;;  %v74_v35 = vadd.f32 1.0, %v64_v29 }
 0x1bc   :  { %v328_v36 = vadd.f32 %v2409_v27, %v319_v34  ;;  %2615 = vmatprep.mubr.msk.f32.mxu1 %vm90_vm0, %v329_v33  ;;  %v2442_v27 = vld [vmem:[%s3384_s6 + $0x38] sm:$0xff]  ;;  %v75_v32 = vadd.f32 1.0, %v67_v31  ;;  %v70_v34 = vpop.xlane.xlu0 %69 }
 0x1bd   :  { %v2836_v28 = vpack.c.bf16 %v2442_v27, %v2441_v26  ;;  %v76_v41 = vadd.f32 1.0, %v70_v34 }
 0x1be   :  { %v330_v37 = vmax.f32 %v328_v36, 0.0  ;;  %2896 = vrcp.f32 %v75_v32  ;;  %v2452_v32 = vld [vmem:[%s3385_s7 + $0x1] ss:$0 sm:$0xff] }
 0x1bf   :  { %v73_v33 = vpop.xlane.xlu1 %72  ;;  %2898 = vrcp.f32 %v74_v35 }
 0x1c0   :  { %2616 = vmatmul.mubr.msk.f32.vlgmr.msra.gmra.mrb[4].mxu1 %vm90_vm0, %v330_v37  ;;  %v3208_v37 = vld [vmem:[%s3383_s5 + $0x2] ss:$0 sm:$0xff]  ;;  %v77_v40 = vadd.f32 1.0, %v73_v33 }
 0x1c1   :  { %2620 = vmatprep.mubr.msk.f32.mxu1 %vm2945_vm1, %v2944_v8 }
 0x1c2   :  { %2900 = vrcp.f32 %v77_v40 }
 0x1c3   :  { %2902 = vrcp.f32 %v76_v41 }
 0x293   :  { %v2617_v38 = vpop.f32.mrb[4].mxu1 }
 0x294   :  { %v408_v39 = vpop.f32.mrb[5].mxu1  ;;  %2624 = vmatpush3.msra.mxu0 %v2617_v38 }
 0x295   :  { %2619 = vmatpush3.msra.mxu1 %v408_v39  ;;  %2626 = vmatmul.mubr.msk.f32.vlgmr.msra.gmra.mrb[2].mxu0 %vm48_vm2, %v3045_v11 }
 0x296   :  { %2621 = vmatmul.mubr.msk.f32.vlgmr.msra.gmra.mrb[6].mxu1 %vm48_vm2, %v3038_v9  ;;  %2639 = vmatprep.subr.mxu0 %v2944_v8 }
 0x297   :  { %2641 = vmatprep.mubr.msk.f32.mxu0 %vm2945_vm1, %v2944_v8  ;;  %2809 = vmatprep.subr.bf16.mxu1 %v2808_v42 }
 0x298   :  { %2811 = vmatpush3.bf16.msra.mxu1 %v2808_v42 }
 0x299   :  { %2813 = vmatprep.subr.bf16.mxu1 %v2812_v45 }
 0x29c   :  { %2815 = vmatpush3.bf16.msra.mxu1 %v2812_v45  ;;  %v3214_v45 = vpop.eup %2896 }
 0x29d   :  { %2817 = vmatprep.subr.bf16.mxu1 %v2816_v48 }
 0x368   :  { %v553_v49 = vpop.f32.mrb[2].mxu0 }
 0x369   :  { %v558_v51 = vmul.f32 %v3075_v30, %v553_v49  ;;  %v483_v52 = vpop.f32.mrb[6].mxu1  ;;  %v2627_v53 = vpop.f32.mrb[3].mxu0 }
 0x36a   :  { %v557_v54 = vmul.f32 %v3069_v25, %v483_v52  ;;  %v2622_v55 = vpop.f32.mrb[7].mxu1 }
 0x36b   :  { %v568_v56 = vadd.f32 %v2419_v50, %v558_v51 }
 0x36c   :  { %v567_v57 = vadd.f32 %v2419_v50, %v557_v54 }
 0x36d   :  { %v570_v61 = vmax.f32 %v568_v56, 0.0 }
 0x36e   :  { %v569_v60 = vmax.f32 %v567_v57, 0.0 }
 0x370   :  { %2636 = vmatprep.mubr.msk.f32.mxu1 %vm90_vm0, %v569_v60 }
 0x371   :  { %2637 = vmatmul.mubr.msk.f32.vlgmr.msra.gmra.mrb[8].mxu1 %vm90_vm0, %v570_v61 }
 0x372   :  { %2819 = vmatpush3.bf16.msra.mxu1 %v2816_v48  ;;  %2657 = vmatprep.mubr.msk.f32.mxu1 %vm90_vm0, %v3121_v63 }
 0x373   :  { %2821 = vmatprep.subr.bf16.mxu1 %v2820_v62 }
 0x376   :  { %2823 = vmatpush3.bf16.msra.mxu1 %v2820_v62 }
 0x379   :  { %2658 = vmatmul.mubr.msk.f32.vlgmr.msra.gmra.mrb[10].mxu1 %vm90_vm0, %v3130_v0 }
 0x37a   :  { %2660 = vmatprep.mubr.msk.f32.mxu1 %vm90_vm0, %v3135_v1 }
 0x37d   :  { %2661 = vmatmul.mubr.msk.f32.gmra.mrb[12].mxu1 %vm90_vm0, %v3144_v2 }
 0x444   :  { %v2638_v16 = vpop.f32.mrb[8].mxu1 }
 0x445   :  { %v648_v17 = vpop.f32.mrb[9].mxu1 }
 0x446   :  { %2640 = vmatpush3.msra.mxu0 %v648_v17 }
 0x447   :  { %2642 = vmatmul.mubr.msk.f32.vlgmr.msra.gmra.mrb[4].mxu0 %vm48_vm2, %v3038_v9  ;;  %2644 = vmatprep.subr.mxu0 %v2944_v8 }
 0x448   :  { %2645 = vmatpush3.msra.mxu0 %v2638_v16  ;;  %2646 = vmatprep.mubr.msk.f32.mxu0 %vm2945_vm1, %v2944_v8 }
 0x44b   :  { %2647 = vmatmul.mubr.msk.f32.vlgmr.msra.gmra.mrb[6].mxu0 %vm48_vm2, %v3045_v11  ;;  %v2439_v11 = vld [vmem:[%s3384_s6 + $0x20] sm:$0xff] }
 0x44c   :  { %v2659_v18 = vpop.f32.mrb[10].mxu1  ;;  %2667 = vmatprep.mubr.msk.f32.mxu0 %vm61_vm3, %v3151_v3  ;;  %v2832_v24 = vpack.c.bf16 %v2440_v23, %v2439_v11  ;;  %v2456_v11 = vld [vmem:[%s3384_s6 + $0x58] sm:$0xff] }
 0x44d   :  { %v893_v19 = vpop.f32.mrb[11].mxu1 }
 0x44e   :  { %v2824_v20 = vpack.c.bf16 %v2659_v18, %v893_v19  ;;  %2833 = vmatprep.subr.bf16.mxu1 %v2832_v24 }
 0x44f   :  { %2835 = vmatpush3.bf16.msra.mxu1 %v2832_v24 }
 0x450   :  { %v2662_v21 = vpop.f32.mrb[12].mxu1  ;;  %2825 = vmatprep.subr.bf16.mxu0 %v2824_v20  ;;  %2837 = vmatprep.subr.bf16.mxu1 %v2836_v28 }
 0x451   :  { %v903_v22 = vpop.f32.mrb[13].mxu1  ;;  %2827 = vmatpush3.bf16.msra.mxu0 %v2824_v20  ;;  %v2453_v20 = vld [vmem:[%s3384_s6 + $0x40] sm:$0xff] }
 0x452   :  { %v2828_v9 = vpack.c.bf16 %v2662_v21, %v903_v22  ;;  %v2454_v21 = vld [vmem:[%s3384_s6 + $0x48] sm:$0xff] }
 0x453   :  { %2839 = vmatpush3.bf16.msra.mxu1 %v2836_v28  ;;  %v2848_v22 = vpack.c.bf16 %v2454_v21, %v2453_v20  ;;  %v2946_v21 = vmov 0.0|0.0  }
 0x454   :  { %2668 = vmatmul.mubr.msk.f32.vlgmr.msra.gmra.mrb[8].mxu0 %vm61_vm3, %v3165_v12  ;;  %2829 = vmatprep.subr.bf16.mxu0 %v2828_v9 }
 0x455   :  { %2831 = vmatpush3.bf16.msra.mxu0 %v2828_v9  ;;  %2674 = vmatprep.mubr.msk.f32.mxu0 %vm61_vm3, %v3156_v4  ;;  %v2455_v9 = vld [vmem:[%s3384_s6 + $0x50] sm:$0xff] }
 0x456   :  { %2849 = vmatprep.subr.bf16.mxu1 %v2848_v22 }
 0x458   :  { %2675 = vmatmul.mubr.msk.f32.vlgmr.msra.gmra.mrb[10].mxu0 %vm61_vm3, %v3172_v14 }
 0x459   :  { %2695 = vmatprep.mubr.msk.f32.mxu0 %vm61_vm3, %v3151_v3 }
 0x51a   :  { %v723_v36 = vpop.f32.mrb[4].mxu0 }
 0x51b   :  { %v797_v38 = vmul.f32 %v3069_v25, %v723_v36  ;;  %v2643_v39 = vpop.f32.mrb[5].mxu0  ;;  %v3219_v25 = vpop.eup %2898 }
 0x51c   :  { %v3222_v50 = vpop.eup %2900 }
 0x51d   :  { %v3212_v42 = vadd.f32 %v3208_v37, %v797_v38  ;;  %v3225_v52 = vpop.eup %2902 }
 0x51e   :  { %v793_v43 = vpop.f32.mrb[6].mxu0 }
 0x51f   :  { %v2648_v44 = vpop.f32.mrb[7].mxu0  ;;  %v798_v23 = vmul.f32 %v3075_v30, %v793_v43 }
 0x521   :  { %v808_v24 = vadd.f32 %v3208_v37, %v798_v23 }
 0x523   :  { %v810_v26 = vmax.f32 %v808_v24, 0.0 }
 0x525   :  { %v1644_v27 = vsel %vm90_vm0, %v810_v26, 0.0 }
 0x526   :  { %v1645_v28 = vrot.slane %v1644_v27, 4 }
 0x527   :  { %v2669_v46 = vpop.f32.mrb[8].mxu0 }
 0x528   :  { %v1075_v48 = vmul.f32 %v3214_v45, %v2669_v46  ;;  %v984_v49 = vpop.f32.mrb[9].mxu0  ;;  %v1646_v29 = vadd.f32 %v1645_v28, %v1644_v27 }
 0x529   :  { %v1074_v51 = vmul.f32 %v3219_v25, %v984_v49 }
 0x52a   :  { %v1086_v53 = vadd.f32 %v2438_v47, %v1075_v48  ;;  %v1647_v36 = vrot.slane %v1646_v29, 2 }
 0x52b   :  { %v1085_v54 = vadd.f32 %v2438_v47, %v1074_v51  ;;  %v2676_v55 = vpop.f32.mrb[10].mxu0 }
 0x52c   :  { %v1077_v56 = vmul.f32 %v3222_v50, %v2676_v55  ;;  %v1065_v57 = vpop.f32.mrb[11].mxu0  ;;  %v1090_v60 = vmax.f32 %v1086_v53, 0.0  ;;  %v1648_v44 = vadd.f32 %v1647_v36, %v1646_v29  ;;  %v809_v55 = vmax.f32 %v3212_v42, 0.0 }
 0x52d   :  { %v1089_v58 = vmax.f32 %v1085_v54, 0.0  ;;  %v1076_v59 = vmul.f32 %v3225_v52, %v1065_v57 }
 0x52e   :  { %v1088_v61 = vadd.f32 %v2438_v47, %v1077_v56  ;;  %v1649_v51 = vrot.slane %v1648_v44, 1  ;;  %v1637_v56 = vsel %vm90_vm0, %v809_v55, 0.0 }
 0x52f   :  { %v1087_v62 = vadd.f32 %v2438_v47, %v1076_v59  ;;  %2685 = vmatprep.mubr.msk.f32.mxu1 %vm90_vm0, %v1089_v58  ;;  %v1638_v57 = vrot.slane %v1637_v56, 4 }
 0x530   :  { %2686 = vmatmul.mubr.msk.f32.vlgmr.msra.gmra.mrb[14].mxu1 %vm90_vm0, %v1090_v60  ;;  %v1092_v10 = vmax.f32 %v1088_v61, 0.0  ;;  %v1650_v54 = vadd.f32 %v1649_v51, %v1648_v44 }
 0x531   :  { %v1091_v6 = vmax.f32 %v1087_v62, 0.0  ;;  %2851 = vmatpush3.bf16.msra.mxu1 %v2848_v22  ;;  %v1639_v61 = vadd.f32 %v1638_v57, %v1637_v56 }
 0x533   :  { %2688 = vmatprep.mubr.msk.f32.mxu1 %vm90_vm0, %v1091_v6 }
 0x534   :  { %2689 = vmatmul.mubr.msk.f32.gmra.mrb[16].mxu1 %vm90_vm0, %v1092_v10 }
 0x603   :  { %v2687_v13 = vpop.f32.mrb[14].mxu1 }
 0x604   :  { %v1176_v15 = vpop.f32.mrb[15].mxu1 }
 0x605   :  { %v2840_v16 = vpack.c.bf16 %v2687_v13, %v1176_v15  ;;  %v1640_v13 = vrot.slane %v1639_v61, 2 }
 0x607   :  { %v2690_v17 = vpop.f32.mrb[16].mxu1  ;;  %2841 = vmatprep.subr.bf16.mxu0 %v2840_v16 }
 0x608   :  { %v1186_v18 = vpop.f32.mrb[17].mxu1  ;;  %2843 = vmatpush3.bf16.msra.mxu0 %v2840_v16  ;;  %v1641_v16 = vadd.f32 %v1640_v13, %v1639_v61 }
 0x609   :  { %v2844_v19 = vpack.c.bf16 %v2690_v17, %v1186_v18 }
 0x60b   :  { %2696 = vmatmul.mubr.msk.f32.vlgmr.msra.gmra.mrb[12].mxu0 %vm61_vm3, %v3165_v12  ;;  %2845 = vmatprep.subr.bf16.mxu0 %v2844_v19 }
 0x60c   :  { %2847 = vmatpush3.bf16.msra.mxu0 %v2844_v19  ;;  %2702 = vmatprep.mubr.msk.f32.mxu0 %vm61_vm3, %v3156_v4 }
 0x60f   :  { %2703 = vmatmul.mubr.msk.f32.vlgmr.msra.gmra.mrb[14].mxu0 %vm61_vm3, %v3172_v14 }
 0x610   :  { %2723 = vmatprep.mubr.msk.f32.mxu0 %vm61_vm3, %v3151_v3  ;;  %v2852_v3 = vpack.c.bf16 %v2456_v11, %v2455_v9 }
 0x612   :  { %2853 = vmatprep.subr.bf16.mxu1 %v2852_v3 }
 0x613   :  { %2855 = vmatpush3.bf16.msra.mxu1 %v2852_v3 }
 0x614   :  { %2738 = vmatprep.subr.mxu1 %v2944_v8 }
 0x6de   :  { %v2697_v31 = vpop.f32.mrb[12].mxu0 }
 0x6df   :  { %v1346_v33 = vmul.f32 %v3214_v45, %v2697_v31  ;;  %v1261_v34 = vpop.f32.mrb[13].mxu0 }
 0x6e0   :  { %v1345_v35 = vmul.f32 %v3219_v25, %v1261_v34 }
 0x6e1   :  { %v1358_v38 = vadd.f32 %v2452_v32, %v1346_v33 }
 0x6e2   :  { %v1357_v30 = vadd.f32 %v2452_v32, %v1345_v35  ;;  %v2704_v39 = vpop.f32.mrb[14].mxu0 }
 0x6e3   :  { %v1348_v37 = vmul.f32 %v3222_v50, %v2704_v39  ;;  %v1336_v40 = vpop.f32.mrb[15].mxu0  ;;  %v1362_v46 = vmax.f32 %v1358_v38, 0.0 }
 0x6e4   :  { %v1361_v41 = vmax.f32 %v1357_v30, 0.0  ;;  %v1347_v43 = vmul.f32 %v3225_v52, %v1336_v40 }
 0x6e5   :  { %v1360_v47 = vadd.f32 %v2452_v32, %v1348_v37 }
 0x6e6   :  { %v1359_v48 = vadd.f32 %v2452_v32, %v1347_v43  ;;  %2713 = vmatprep.mubr.msk.f32.mxu1 %vm90_vm0, %v1361_v41 }
 0x6e7   :  { %2714 = vmatmul.mubr.msk.f32.vlgmr.msra.gmra.mrb[18].mxu1 %vm90_vm0, %v1362_v46  ;;  %v1364_v53 = vmax.f32 %v1360_v47, 0.0 }
 0x6e8   :  { %v1363_v49 = vmax.f32 %v1359_v48, 0.0  ;;  %2739 = vmatpush3.xpose.msk.msra.mxu1 %vm90_vm0, %v3025_v7  ;;  %v2869_v48 = vpack.c.bf16 %v3144_v2, %v3135_v1 }
 0x6e9   :  { %2748 = vmatprep.subr.mxu1 %v2944_v8 }
 0x6ea   :  { %2716 = vmatprep.mubr.msk.f32.mxu1 %vm90_vm0, %v1363_v49 }
 0x6eb   :  { %2717 = vmatmul.mubr.msk.f32.gmra.mrb[20].mxu1 %vm90_vm0, %v1364_v53 }
 0x6ec   :  { %2740 = vmatprep.mubr.msk.f32.mxu1 %vm2945_vm1, %v2944_v8 }
 0x6ef   :  { %2741 = vmatmul.mubr.msk.f32.vlgmr.msra.gmra.mrb[22].mxu1 %vm90_vm0, %v1650_v54 }
 0x6f0   :  { %2749 = vmatpush3.msra.mxu1 %v3025_v7  ;;  %2750 = vmatprep.mubr.msk.f32.mxu1 %vm2945_vm1, %v2944_v8 }
 0x6f1   :  { %2868 = vmatprep.subr.bf16.mxu1 %v2946_v21 }
 0x7ba   :  { %v2715_v58 = vpop.f32.mrb[18].mxu1 }
 0x7bb   :  { %v1448_v59 = vpop.f32.mrb[19].mxu1 }
 0x7bc   :  { %v2856_v60 = vpack.c.bf16 %v2715_v58, %v1448_v59 }
 0x7be   :  { %v2718_v62 = vpop.f32.mrb[20].mxu1  ;;  %2857 = vmatprep.subr.bf16.mxu0 %v2856_v60 }
 0x7bf   :  { %v1458_v6 = vpop.f32.mrb[21].mxu1  ;;  %2859 = vmatpush3.bf16.msra.mxu0 %v2856_v60 }
 0x7c0   :  { %v2860_v10 = vpack.c.bf16 %v2718_v62, %v1458_v6 }
 0x7c2   :  { %2724 = vmatmul.mubr.msk.f32.vlgmr.msra.gmra.mrb[16].mxu0 %vm61_vm3, %v3165_v12  ;;  %2861 = vmatprep.subr.bf16.mxu0 %v2860_v10  ;;  %v1793_v7 = vpop.f32.mrb[22].mxu1  ;;  %v1642_v12 = vrot.slane %v1641_v16, 1 }
 0x7c3   :  { %2863 = vmatpush3.bf16.msra.mxu0 %v2860_v10  ;;  %v2742_v42 = vpop.f32.mrb[23].mxu1  ;;  %v1801_v15 = vsel %vm1797_vm4, %v1793_v7, -inf  ;;  %2730 = vmatprep.mubr.msk.f32.mxu0 %vm61_vm3, %v3156_v4 }
 0x7c4   :  { %1802 = vmax.xlane.f32.xlu0 %v1801_v15  ;;  %2733 = vmatprep.subr.mxu0 %v2944_v8  ;;  %v1643_v17 = vadd.f32 %v1642_v12, %v1641_v16  ;;  %v2865_v42 = vpack.c.bf16 %v3130_v0, %v3121_v63 }
 0x7c6   :  { %2731 = vmatmul.mubr.msk.f32.vlgmr.msra.gmra.mrb[18].mxu0 %vm61_vm3, %v3172_v14 }
 0x7c7   :  { %2735 = vmatprep.mubr.msk.f32.mxu0 %vm2945_vm1, %v2944_v8 }
 0x7cc   :  { %2734 = vmatpush3.xpose.msk.msra.mxu0 %vm90_vm0, %v3018_v5 }
 0x7cd   :  { %2743 = vmatprep.subr.mxu0 %v2944_v8 }
 0x7cf   :  { %2736 = vmatmul.mubr.msk.f32.vlgmr.msra.gmra.mrb[20].mxu0 %vm90_vm0, %v1643_v17 }
 0x7d0   :  { %2744 = vmatpush3.msra.mxu0 %v3018_v5  ;;  %2745 = vmatprep.mubr.msk.f32.mxu0 %vm2945_vm1, %v2944_v8  ;;  %v2466_v5 = vld [vmem:[%s3385_s7 + $0x2] ss:$0 sm:$0xff] }
 0x7d1   :  { %2864 = vmatprep.subr.bf16.mxu0 %v2946_v21 }
 0x851   :  { %v1803_v4 = vpop.xlane.xlu0 %1802 }
 0x852   :  { %v1805_v18 = vsub.f32 %v1793_v7, %v1803_v4 }
 0x854   :  { %v1808_v14 = vmul.f32 1.442695, %v1805_v18 }
 0x856   :  { %2904 = vpow2.f32 %v1808_v14 }
 0x860   :  { %v2905_v19 = vpop.eup %2904 }
 0x861   :  { %v1813_v20 = vsel %vm1797_vm4, %v2905_v19, 0.0 }
 0x862   :  { %1814 = vadd.xlane.f32.xlu0 %v1813_v20 }
 0x895   :  { %v2725_v22 = vpop.f32.mrb[16].mxu0 }
 0x896   :  { %v1618_v9 = vmul.f32 %v3214_v45, %v2725_v22  ;;  %v1533_v11 = vpop.f32.mrb[17].mxu0 }
 0x897   :  { %v1617_v3 = vmul.f32 %v3219_v25, %v1533_v11 }
 0x898   :  { %v1630_v23 = vadd.f32 %v2466_v5, %v1618_v9 }
 0x899   :  { %v1629_v24 = vadd.f32 %v2466_v5, %v1617_v3  ;;  %v2732_v26 = vpop.f32.mrb[18].mxu0 }
 0x89a   :  { %v1634_v27 = vmax.f32 %v1630_v23, 0.0  ;;  %v1620_v28 = vmul.f32 %v3222_v50, %v2732_v26  ;;  %v1608_v29 = vpop.f32.mrb[19].mxu0 }
 0x89b   :  { %v1633_v31 = vmax.f32 %v1629_v24, 0.0  ;;  %v1619_v32 = vmul.f32 %v3225_v52, %v1608_v29 }
 0x89c   :  { %v1967_v33 = vsel %vm90_vm0, %v1634_v27, 0.0  ;;  %v1632_v34 = vadd.f32 %v2466_v5, %v1620_v28 }
 0x89d   :  { %v1966_v35 = vsel %vm90_vm0, %v1633_v31, 0.0  ;;  %v1631_v36 = vadd.f32 %v2466_v5, %v1619_v32  ;;  %v2301_v32 = vld [vmem:[%s3386_s8] sm:$0xff] }
 0x89e   :  { %v1968_v45 = vadd.f32 %v1967_v33, %v1966_v35  ;;  %v1636_v38 = vmax.f32 %v1632_v34, 0.0  ;;  %v2302_v33 = vld [vmem:[%s3386_s8 + $0x8] sm:$0xff] }
 0x89f   :  { %v1635_v30 = vmax.f32 %v1631_v36, 0.0  ;;  %v2879_v35 = vpack.c.bf16 %v2302_v33, %v2301_v32 }
 0x8a0   :  { %v1976_v25 = vsel %vm90_vm0, %v1636_v38, 0.0  ;;  %v1969_v59 = vrot.slane %v1968_v45, 4  ;;  %v2304_v38 = vld [vmem:[%s3386_s8 + $0x18] sm:$0xff] }
 0x8a1   :  { %v1975_v39 = vsel %vm90_vm0, %v1635_v30, 0.0 }
 0x8a2   :  { %v1977_v37 = vadd.f32 %v1976_v25, %v1975_v39  ;;  %v1720_v40 = vpop.f32.mrb[20].mxu0  ;;  %v1970_v61 = vadd.f32 %v1969_v59, %v1968_v45  ;;  %v2303_v45 = vld [vmem:[%s3386_s8 + $0x10] sm:$0xff]  ;;  %s2920_s8 = scalar_lea.vmem %s2398_s30, 32 }
 0x8a3   :  { %v2737_v50 = vpop.f32.mrb[21].mxu0  ;;  %v1798_v41 = vsel %vm1797_vm4, %v1720_v40, -inf  ;;  %v2882_v30 = vpack.c.bf16 %v2304_v38, %v2303_v45  ;;  %p2921_p0 = scmp.ne.s32.totalorder %s2398_s30, %s2920_s8  ;;  %p2926_p2 = scmp.lt.s32.totalorder %s2920_s8, %s2920_s8 }
 0x8a4   :  { %1799 = vmax.xlane.f32.xlu1 %v1798_v41  ;;  %v1978_v52 = vrot.slane %v1977_v37, 4  ;;  %v1971_v62 = vrot.slane %v1970_v61, 2 }
 0x8a5   :  { %p2927_p3 = por %p2926_p2, %p2925_p1 }
 0x8a6   :  { %v1979_v44 = vadd.f32 %v1978_v52, %v1977_v37  ;;  %v1972_v15 = vadd.f32 %v1971_v62, %v1970_v61 }
 0x8a7   :  { %p2928_p4 = pnand %p2927_p3, %p2921_p0 }
 0x8a8   :  { %v1980_v46 = vrot.slane %v1979_v44, 2  ;;  %v1973_v12 = vrot.slane %v1972_v15, 1 }
 0x8aa   :  { %v1981_v49 = vadd.f32 %v1980_v46, %v1979_v44  ;;  %v1974_v17 = vadd.f32 %v1973_v12, %v1972_v15 }
 0x8ac   :  { %v1982_v54 = vrot.slane %v1981_v49, 1 }
 0x8ae   :  { %v1983_v1 = vadd.f32 %v1982_v54, %v1981_v49 }
 0x8ef   :  { %v1815_v43 = vpop.xlane.xlu0 %1814 }
 0x8f0   :  { %2906 = vrcp.f32 %v1815_v43 }
 0x8fa   :  { %v2907_v47 = vpop.eup %2906 }
 0x8fb   :  { %v1819_v51 = vmul.f32 %v2907_v47, %v2905_v19 }
 0x8fd   :  { %2751 = vmatmul.mubr.msk.f32.vlgmr.msra.gmra.mrb[24].mxu1 %vm48_vm2, %v1819_v51 }
 0x8fe   :  { %2871 = vmatpush3.bf16.xpose.msk.msra.mxu1 %vm3315_vm5, %v2869_v48  ;;  %2764 = vmatprep.mubr.msk.f32.mxu1 %vm2945_vm1, %v2944_v8 }
 0x8ff   :  { %2875 = vmatprep.subr.bf16.mxu1 %v2946_v21 }
 0x905   :  { %2765 = vmatmul.mubr.msk.f32.vlgmr.msra.gmra.mrb[26].mxu1 %vm90_vm0, %v1983_v1 }
 0x906   :  { %2877 = vmatpush3.bf16.msra.mxu1 %v2869_v48  ;;  %2778 = vmatprep.mubr.msk.f32.mxu1 %vm2945_vm1, %v2944_v8 }
 0x931   :  { %v1800_v2 = vpop.xlane.xlu1 %1799 }
 0x932   :  { %v1804_v55 = vsub.f32 %v1720_v40, %v1800_v2 }
 0x934   :  { %v1806_v56 = vmul.f32 1.442695, %v1804_v55 }
 0x936   :  { %2908 = vpow2.f32 %v1806_v56 }
 0x940   :  { %v2909_v57 = vpop.eup %2908 }
 0x941   :  { %v1810_v58 = vsel %vm1797_vm4, %v2909_v57, 0.0 }
 0x942   :  { %1811 = vadd.xlane.f32.xlu1 %v1810_v58 }
 0x9cf   :  { %v1812_v60 = vpop.xlane.xlu1 %1811 }
 0x9d0   :  { %2910 = vrcp.f32 %v1812_v60 }
 0x9d8   :  { %v2126_v6 = vpop.f32.mrb[26].mxu1 }
 0x9d9   :  { %v2766_v10 = vpop.f32.mrb[27].mxu1  ;;  %v2134_v13 = vsel %vm2130_vm6, %v2126_v6, -inf }
 0x9da   :  { %v2911_v7 = vpop.eup %2910  ;;  %2135 = vmax.xlane.f32.xlu0 %v2134_v13 }
 0x9db   :  { %v1817_v16 = vmul.f32 %v2911_v7, %v2909_v57 }
 0x9dd   :  { %2746 = vmatmul.mubr.msk.f32.vlgmr.msra.gmra.mrb[22].mxu0 %vm48_vm2, %v1817_v16 }
 0x9de   :  { %2867 = vmatpush3.bf16.xpose.msk.msra.mxu0 %vm3315_vm5, %v2865_v42  ;;  %2757 = vmatprep.mubr.msk.f32.mxu0 %vm2945_vm1, %v2944_v8 }
 0x9df   :  { %2872 = vmatprep.subr.bf16.mxu0 %v2946_v21 }
 0x9e5   :  { %2758 = vmatmul.mubr.msk.f32.vlgmr.msra.gmra.mrb[24].mxu0 %vm90_vm0, %v1974_v17 }
 0x9e6   :  { %2874 = vmatpush3.bf16.msra.mxu0 %v2865_v42  ;;  %2771 = vmatprep.mubr.msk.f32.mxu0 %vm2945_vm1, %v2944_v8 }
 0x9e7   :  { %2878 = vmatprep.subr.bf16.mxu0 %v2946_v21 }
 0xa67   :  { %v2136_v63 = vpop.xlane.xlu0 %2135 }
 0xa68   :  { %v2138_v0 = vsub.f32 %v2126_v6, %v2136_v63 }
 0xa6a   :  { %v2141_v4 = vmul.f32 1.442695, %v2138_v0 }
 0xa6c   :  { %2912 = vpow2.f32 %v2141_v4 }
 0xa76   :  { %v2913_v18 = vpop.eup %2912 }
 0xa77   :  { %v2146_v14 = vsel %vm2130_vm6, %v2913_v18, 0.0 }
 0xa78   :  { %2147 = vadd.xlane.f32.xlu0 %v2146_v14 }
 0xab8   :  { %v2053_v19 = vpop.f32.mrb[24].mxu0 }
 0xab9   :  { %v2759_v20 = vpop.f32.mrb[25].mxu0  ;;  %v2131_v22 = vsel %vm2130_vm6, %v2053_v19, -inf }
 0xaba   :  { %2132 = vmax.xlane.f32.xlu1 %v2131_v22 }
 0xb05   :  { %v2148_v5 = vpop.xlane.xlu0 %2147 }
 0xb06   :  { %2914 = vrcp.f32 %v2148_v5 }
 0xb10   :  { %v2915_v9 = vpop.eup %2914 }
 0xb11   :  { %v2152_v11 = vmul.f32 %v2915_v9, %v2913_v18 }
 0xb13   :  { %2779 = vmatmul.mubr.msk.f32.vlgmr.msra.gmra.mrb[24].mxu1 %vm61_vm3, %v2152_v11 }
 0xb47   :  { %v2133_v3 = vpop.xlane.xlu1 %2132 }
 0xb48   :  { %v2137_v23 = vsub.f32 %v2053_v19, %v2133_v3 }
 0xb4a   :  { %v2139_v24 = vmul.f32 1.442695, %v2137_v23 }
 0xb4c   :  { %2916 = vpow2.f32 %v2139_v24 }
 0xb56   :  { %v2917_v26 = vpop.eup %2916 }
 0xb57   :  { %v2143_v27 = vsel %vm2130_vm6, %v2917_v26, 0.0 }
 0xb58   :  { %2144 = vadd.xlane.f32.xlu1 %v2143_v27 }
 0xbe5   :  { %v2145_v28 = vpop.xlane.xlu1 %2144 }
 0xbe6   :  { %2918 = vrcp.f32 %v2145_v28  ;;  %v2295_v29 = vpop.f32.mrb[24].mxu1 }
 0xbe7   :  { %v2780_v31 = vpop.f32.mrb[25].mxu1  ;;  %v2300_v25 = vmul.f32 0.5, %v2295_v29 }
 0xbe9   :  { %v2314_v37 = vrot.slane %v2300_v25, 7 }
 0xbf0   :  { %v2919_v34 = vpop.eup %2918 }
 0xbf1   :  { %v2150_v36 = vmul.f32 %v2919_v34, %v2917_v26 }
 0xbf3   :  { %2772 = vmatmul.mubr.msk.f32.vlgmr.msra.gmra.mrb[22].mxu0 %vm61_vm3, %v2150_v36 }
 0xbf4   :  { %2880 = vmatpush3.bf16.msra.mxu0 %v2879_v35  ;;  %2789 = vmatprep.mubr.msk.f32.mxu0 %vm2945_vm1, %v2944_v8  ;;  %v2481_v8 = vld [vmem:[%s3387_s9] ss:$0 sm:$0xff] }
 0xbf5   :  { %2881 = vmatprep.subr.bf16.mxu0 %v2946_v21 }
 0xbf8   :  { %2883 = vmatpush3.bf16.msra.mxu0 %v2882_v30 }
 0xcc6   :  { %v2222_v39 = vpop.f32.mrb[22].mxu0 }
 0xcc7   :  { %v2299_v40 = vmul.f32 0.5, %v2222_v39  ;;  %v2773_v50 = vpop.f32.mrb[23].mxu0 }
 0xcc9   :  { %v2316_v41 = vsel %vm2315_vm7, %v2314_v37, %v2299_v40 }
 0xcca   :  { %2790 = vmatmul.mubr.msk.f32.vlgmr.msra.gmra.mrb[26].mxu0 %vm90_vm0, %v2316_v41 }
 0xd9d   :  { %v2385_v21 = vpop.f32.mrb[26].mxu0 }
 0xd9e   :  { %v2386_v52 = vadd.f32 %v2481_v8, %v2385_v21  ;;  %v2791_v43 = vpop.f32.mrb[27].mxu0 }
 0xda0   :  { %2390 = vst.msk [vmem:[#allocation2] sm:$0x3] %vm2389_vm8, %v2386_v52 }
 0xda1   :  { %2931 = shalt.err (!%p2928_p4)
}
 0xda2   :  { %s2932_s13 = scalar_lea.hbm %s3388_s10, 32 }
 0xda3   :  { %p2933_p5 = scmp.ne.s32.totalorder %s3388_s10, %s2932_s13  ;;  %p2936_p6 = scmp.lt.u32.totalorder %s2932_s13, %s3388_s10 }
 0xda5   :  { %p2938_p7 = pnand %p2936_p6, %p2933_p5 }
 0xda7   :  { %2941 = shalt.err (!%p2938_p7)
}
 0xda8   :  { %2400 = dma.vmem_to_hbm [thread:$0]  %s2398_s30, 32, %s3388_s10, [#allocation3]  }
 0xda9   :  { %2942 = dma.done.wait [#allocation3], 32  }
 0xdaa   :  { %2943 = vsyncadd [#allocation3], 4294967264 }
 0xdab   :  { %2404 = vsyncpa [#allocation3], 1 }

</bundles_post_ra>
